<compile_context>
chip_gen: v7x
topology: tpu7x:2x2x1
jax: 0.10.0
libtpu: 0.0.40
codegen_flags: <defaults>
</compile_context>

<pallas_src>
import functools

import jax
import jax.numpy as jnp
from jax import lax
from jax.experimental import pallas as pl
from jax.experimental.pallas import tpu as pltpu


def _iclassifier_kernel(x_ref, w1t_ref, b1_ref, w2t_ref, b2_ref,
                        feats_ref, c_ref, acc_ref, *, hw_total):
    # x_ref    : (TN, C, THW)  stream dtype (bf16) -- spatial on lanes
    # w1t_ref  : (F, C)        stream dtype -- 1x1 conv weight (out, in)
    # b1_ref   : (F, 1)  f32   -- conv bias
    # w2t_ref  : (F, O)  f32   -- fc weight, pre-transposed
    # b2_ref   : (1, O)  f32   -- fc bias
    # feats_ref: (TN, 1, F) f32 ; c_ref: (TN, 1, O) f32
    # acc_ref  : (TN, F, 128) f32 -- lane-folded running spatial sums
    j = pl.program_id(1)
    n_hw = pl.num_programs(1)
    TN, _, THW = x_ref.shape

    @pl.when(j == 0)
    def _():
        acc_ref[...] = jnp.zeros_like(acc_ref)

    w1t = w1t_ref[...]                      # (F, C), tiny, VMEM resident
    b1 = b1_ref[...]                        # (F, 1) f32

    n_chunks = THW // 128 if THW % 128 == 0 else 0

    def per_instance(n, carry):
        # One (C, THW) slab per instance; channel contraction on the MXU
        # (K = C), f32 accumulate.  Only one (F, THW) slab is live at a time,
        # so the register file never overflows.
        xn = x_ref[n]                                                # (C, THW)
        hn = jnp.dot(w1t, xn, preferred_element_type=jnp.float32)   # (F, THW)
        hn = jnp.maximum(hn + b1, 0.0)                               # bias+ReLU
        if n_chunks > 0:
            # Lane-folded partial sum: pure VPU adds on aligned 128-wide vreg
            # columns; the single XLU cross-lane reduce is deferred to the
            # finalize block.
            part = hn[:, 0:128]
            for cidx in range(1, n_chunks):
                part = part + hn[:, cidx * 128:(cidx + 1) * 128]
            acc_ref[n] += part
        else:
            # THW not a multiple of 128 (fallback): reduce now, park in lane 0
            # (other lanes stay zero, so the finalize reduce is still exact).
            acc_ref[n, :, 0:1] += jnp.sum(hn, axis=-1, keepdims=True)
        return carry

    lax.fori_loop(0, TN, per_instance, 0, unroll=True)

    @pl.when(j == n_hw - 1)
    def _():
        inv_hw = 1.0 / float(hw_total)
        # Single cross-lane reduce per i-block finishes the global avg pool.
        feats = jnp.sum(acc_ref[...], axis=-1) * inv_hw              # (TN, F)
        feats_ref[...] = feats[:, None, :].astype(feats_ref.dtype)
        logits = jnp.dot(feats, w2t_ref[...],
                         preferred_element_type=jnp.float32) + b2_ref[...]
        c_ref[...] = logits[:, None, :].astype(c_ref.dtype)


def _pick_tile_hw(hw):
    if hw % 128 == 0:
        for cand in (2048, 1024, 512, 256, 128):
            if hw % cand == 0:
                return cand
    return hw            # single spatial block (fallback reduce path)


def _pick_tile_n(n, f, c, tile_hw):
    if n <= 1:
        return 1
    # At least 2 i-blocks so v7x's two TensorCores both get work.
    tn = max(1, min(32, n // 2))

    def est(t):          # rough per-core VMEM estimate (bytes)
        x_blk = t * c * tile_hw * 2        # bf16 stream, per buffer
        acc = t * f * 128 * 4
        return 3 * x_blk + acc

    while tn > 1 and est(tn) > (16 << 20):
        tn //= 2
    return tn


def iclassifier_forward(x_nchw, conv_w, conv_b, fc_w, fc_b,
                        *, tile_n=None, tile_hw=None,
                        stream_dtype=jnp.bfloat16):
    """IClassifier forward.

    x_nchw : (N, C, H, W) f32
    conv_w : (F, C)   1x1-conv weight (torch layout, kernel dims squeezed)
    conv_b : (F,)     conv bias
    fc_w   : (O, F)   nn.Linear weight (torch layout)
    fc_b   : (O,)     nn.Linear bias
    Returns (feats (N, F) f32, c (N, O) f32).
    """
    N, C, H, W = x_nchw.shape
    HW = H * W
    F = conv_w.shape[0]
    O = fc_w.shape[0]

    if tile_hw is None:
        tile_hw = _pick_tile_hw(HW)
    assert HW % tile_hw == 0
    if tile_n is None:
        tile_n = _pick_tile_n(N, F, C, tile_hw)

    n_blocks = -(-N // tile_n)
    N_pad = n_blocks * tile_n

    # NCHW -> (N, C, HW): contiguous reshape (no transpose / extra HBM pass);
    # spatial lands on the lane axis so the x DMA stream is lane-dense.
    x = x_nchw.reshape(N, C, HW).astype(stream_dtype)
    if N_pad != N:
        x = jnp.pad(x, ((0, N_pad - N), (0, 0), (0, 0)))

    # Kernel-friendly weight layouts (tiny, one-time cost).
    w1t = conv_w.reshape(F, C).astype(stream_dtype)
    b1 = conv_b.reshape(F, 1).astype(jnp.float32)
    w2t = fc_w.T.astype(jnp.float32)            # (F, O)
    b2 = fc_b.reshape(1, O).astype(jnp.float32)

    grid = (N_pad // tile_n, HW // tile_hw)
    kernel = functools.partial(_iclassifier_kernel, hw_total=HW)

    feats3, c3 = pl.pallas_call(
        kernel,
        out_shape=(
            jax.ShapeDtypeStruct((N_pad, 1, F), jnp.float32),
            jax.ShapeDtypeStruct((N_pad, 1, O), jnp.float32),
        ),
        grid_spec=pltpu.PrefetchScalarGridSpec(
            num_scalar_prefetch=0,
            grid=grid,
            in_specs=[
                # x: new block every (i, j) step -> pipelined DMA
                pl.BlockSpec((tile_n, C, tile_hw), lambda i, j: (i, 0, j)),
                # weights: constant index_map -> DMA'd once, VMEM-resident
                pl.BlockSpec((F, C), lambda i, j: (0, 0)),
                pl.BlockSpec((F, 1), lambda i, j: (0, 0)),
                pl.BlockSpec((F, O), lambda i, j: (0, 0)),
                pl.BlockSpec((1, O), lambda i, j: (0, 0)),
            ],
            out_specs=(
                # outputs depend only on i -> resident across the j reduction
                pl.BlockSpec((tile_n, 1, F), lambda i, j: (i, 0, 0)),
                pl.BlockSpec((tile_n, 1, O), lambda i, j: (i, 0, 0)),
            ),
            scratch_shapes=[pltpu.VMEM((tile_n, F, 128), jnp.float32)],
        ),
        compiler_params=pltpu.CompilerParams(
            # N axis parallel (megacore on v7x), spatial reduction arbitrary.
            dimension_semantics=("parallel", "arbitrary"),
            # Above v5e's 16 MiB default, equal to v6e/v7x default scope.
            vmem_limit_bytes=32 * 1024 * 1024,
        ),
    )(x, w1t, b1, w2t, b2)

    feats = feats3.reshape(N_pad, F)[:N]
    c = c3.reshape(N_pad, O)[:N]
    return feats, c


def _reference(x_nchw, conv_w, conv_b, fc_w, fc_b):
    # Pure-JAX f32 reference for the same synthetic module.
    N, C, H, W = x_nchw.shape
    F = conv_w.shape[0]
    x = x_nchw.reshape(N, C, H * W)
    h = jnp.einsum('fc,ncl->nfl', conv_w.reshape(F, C), x)
    h = jnp.maximum(h + conv_b.reshape(1, F, 1), 0.0)
    feats = jnp.mean(h, axis=-1)                     # (N, F)
    c = feats @ fc_w.T + fc_b.reshape(1, -1)
    return feats, c


if __name__ == "__main__":
    # Small shapes: batch=2, channels=4, spatial=16x16,
    # feature_size=32, output_class=3.
    N, C, H, W = 2, 4, 16, 16
    feature_size, output_class = 32, 3

    key = jax.random.PRNGKey(0)
    kx, k1, kb1, k2, kb2 = jax.random.split(key, 5)

    x = jax.random.normal(kx, (N, C, H, W), dtype=jnp.float32)

    # Feature-extractor (1x1 conv) parameters, torch layouts.
    conv_w = 0.1 * jax.random.normal(k1, (feature_size, C), dtype=jnp.float32)
    conv_b = 0.1 * jax.random.normal(kb1, (feature_size,), dtype=jnp.float32)

    # fc = nn.Linear(feature_size, output_class): weight (O, F), bias (O,).
    fc_w = 0.1 * jax.random.normal(k2, (output_class, feature_size),
                                   dtype=jnp.float32)
    fc_b = 0.1 * jax.random.normal(kb2, (output_class,), dtype=jnp.float32)

    feats_ref, c_ref = _reference(x, conv_w, conv_b, fc_w, fc_b)

    # 1) f32 stream: exact check of the kernel structure (tight tolerance).
    feats32, c32 = iclassifier_forward(x, conv_w, conv_b, fc_w, fc_b,
                                       stream_dtype=jnp.float32)
    jax.block_until_ready((feats32, c32))
    assert feats32.shape == (N, feature_size)
    assert c32.shape == (N, output_class)
    assert jnp.allclose(feats32, feats_ref, atol=1e-4, rtol=1e-4)
    assert jnp.allclose(c32, c_ref, atol=1e-4, rtol=1e-4)

    # 2) default bf16 HBM stream (f32 accumulate): loose tolerance vs f32 ref.
    feats, c = iclassifier_forward(x, conv_w, conv_b, fc_w, fc_b)
    jax.block_until_ready((feats, c))
    assert feats.shape == (N, feature_size)
    assert c.shape == (N, output_class)
    assert jnp.allclose(feats, feats_ref, atol=2e-2, rtol=2e-2)
    assert jnp.allclose(c, c_ref, atol=2e-2, rtol=2e-2)

    print("KERNEL_OK")
</pallas_src>

<mosaic_0001>
module attributes {stable_mosaic.version = 11 : i64} {
  func.func @_iclassifier_kernel(%arg0: i32, %arg1: i32, %arg2: memref<1x4x256xf32, #tpu.memory_space<vmem>>, %arg3: memref<32x4xf32, #tpu.memory_space<vmem>>, %arg4: memref<32x1xf32, #tpu.memory_space<vmem>>, %arg5: memref<32x3xf32, #tpu.memory_space<vmem>>, %arg6: memref<1x3xf32, #tpu.memory_space<vmem>>, %arg7: memref<1x1x32xf32, #tpu.memory_space<vmem>>, %arg8: memref<1x1x3xf32, #tpu.memory_space<vmem>>, %arg9: memref<1x32x128xf32, #tpu.memory_space<vmem>>) attributes {dimension_semantics = [#tpu.dimension_semantics<parallel>, #tpu.dimension_semantics<arbitrary>], iteration_bounds = array<i64: 2, 1>, scalar_prefetch = 0 : i64, scratch_operands = 1 : i64, tpu.core_type = #tpu.core_type<tc>, window_params = [{transform_indices = @transform_0, window_bounds = array<i64: 1, 4, 256>}, {pipeline_mode = #tpu.pipeline_mode<synchronous>, transform_indices = @transform_1, window_bounds = array<i64: 32, 4>}, {pipeline_mode = #tpu.pipeline_mode<synchronous>, transform_indices = @transform_2, window_bounds = array<i64: 32, 1>}, {pipeline_mode = #tpu.pipeline_mode<synchronous>, transform_indices = @transform_3, window_bounds = array<i64: 32, 3>}, {pipeline_mode = #tpu.pipeline_mode<synchronous>, transform_indices = @transform_4, window_bounds = array<i64: 1, 3>}, {transform_indices = @transform_5, window_bounds = array<i64: 1, 1, 32>}, {transform_indices = @transform_6, window_bounds = array<i64: 1, 1, 3>}]} {
    %c0_i32 = arith.constant 0 : i32
    %0 = arith.cmpi eq, %arg1, %c0_i32 : i32
    %1 = arith.extui %0 : i1 to i32
    %c0_i32_0 = arith.constant 0 : i32
    %2 = arith.cmpi ne, %1, %c0_i32_0 : i32
    scf.if %2 {
      %cst_14 = arith.constant 0.000000e+00 : f32
      %27 = vector.broadcast %cst_14 : f32 to vector<1x32x128xf32>
      %c0_15 = arith.constant 0 : index
      %c0_16 = arith.constant 0 : index
      %c0_17 = arith.constant 0 : index
      %28 = vector.load %arg9[%c0_15, %c0_16, %c0_17] : memref<1x32x128xf32, #tpu.memory_space<vmem>>, vector<1x32x128xf32>
      tpu.vector_store %arg9[%c0_15, %c0_16, %c0_17], %27 {strides = array<i32>} : memref<1x32x128xf32, #tpu.memory_space<vmem>>, vector<1x32x128xf32>,
    } else {
    }
    %c0 = arith.constant 0 : index
    %c0_1 = arith.constant 0 : index
    %3 = vector.load %arg3[%c0, %c0_1] : memref<32x4xf32, #tpu.memory_space<vmem>>, vector<32x4xf32>
    %c0_2 = arith.constant 0 : index
    %c0_3 = arith.constant 0 : index
    %4 = vector.load %arg4[%c0_2, %c0_3] : memref<32x1xf32, #tpu.memory_space<vmem>>, vector<32x1xf32>
    %c0_i32_4 = arith.constant 0 : i32
    %5 = arith.index_cast %c0_i32_4 : i32 to index
    %c0_5 = arith.constant 0 : index
    %c0_6 = arith.constant 0 : index
    %6 = vector.load %arg2[%5, %c0_5, %c0_6] : memref<1x4x256xf32, #tpu.memory_space<vmem>>, vector<1x4x256xf32>
    %7 = vector.shape_cast %6 : vector<1x4x256xf32> to vector<4x256xf32>
    %cst = arith.constant dense<0.000000e+00> : vector<32x256xf32>
    %8 = tpu.matmul %3, %7, %cst {dimension_numbers = #tpu.dot_dimension_numbers<[1], [0], [0], [1], [0, 0, 1, 1], [], []>} : vector<32x4xf32>, vector<4x256xf32>, vector<32x256xf32> -> vector<32x256xf32>
    %9 = vector.broadcast %4 : vector<32x1xf32> to vector<32x256xf32>
    %10 = arith.addf %8, %9 : vector<32x256xf32>
    %cst_7 = arith.constant 0.000000e+00 : f32
    %11 = vector.broadcast %cst_7 : f32 to vector<32x256xf32>
    %12 = arith.maximumf %10, %11 : vector<32x256xf32>
    %13 = vector.extract_strided_slice %12 {offsets = [0, 0], sizes = [32, 128], strides = [1, 1]} : vector<32x256xf32> to vector<32x128xf32>
    %14 = vector.extract_strided_slice %12 {offsets = [0, 128], sizes = [32, 128], strides = [1, 1]} : vector<32x256xf32> to vector<32x128xf32>
    %15 = arith.addf %13, %14 : vector<32x128xf32>
    %16 = arith.index_cast %c0_i32_4 : i32 to index
    %c0_8 = arith.constant 0 : index
    %c0_9 = arith.constant 0 : index
    %17 = vector.load %arg9[%16, %c0_8, %c0_9] : memref<1x32x128xf32, #tpu.memory_space<vmem>>, vector<1x32x128xf32>
    %18 = vector.shape_cast %17 : vector<1x32x128xf32> to vector<32x128xf32>
    %19 = arith.addf %18, %15 : vector<32x128xf32>
    %20 = arith.index_cast %c0_i32_4 : i32 to index
    %c0_10 = arith.constant 0 : index
    %c0_11 = arith.constant 0 : index
    %21 = vector.load %arg9[%20, %c0_10, %c0_11] : memref<1x32x128xf32, #tpu.memory_space<vmem>>, vector<1x32x128xf32>
    %22 = vector.shape_cast %21 : vector<1x32x128xf32> to vector<32x128xf32>
    %23 = vector.shape_cast %19 : vector<32x128xf32> to vector<1x32x128xf32>
    tpu.vector_store %arg9[%20, %c0_10, %c0_11], %23 {strides = array<i32>} : memref<1x32x128xf32, #tpu.memory_space<vmem>>, vector<1x32x128xf32>,
    %c1_i32 = arith.constant 1 : i32
    %c0_i32_12 = arith.constant 0 : i32
    %24 = arith.cmpi eq, %arg1, %c0_i32_12 : i32
    %25 = arith.extui %24 : i1 to i32
    %c0_i32_13 = arith.constant 0 : i32
    %26 = arith.cmpi ne, %25, %c0_i32_13 : i32
    scf.if %26 {
      %c0_14 = arith.constant 0 : index
      %c0_15 = arith.constant 0 : index
      %c0_16 = arith.constant 0 : index
      %27 = vector.load %arg9[%c0_14, %c0_15, %c0_16] : memref<1x32x128xf32, #tpu.memory_space<vmem>>, vector<1x32x128xf32>
      %cst_17 = arith.constant dense<0.000000e+00> : vector<1x32xf32>
      %28 = vector.multi_reduction <add>, %27, %cst_17 [2] : vector<1x32x128xf32> to vector<1x32xf32>
      %cst_18 = arith.constant 3.906250e-03 : f32
      %29 = vector.broadcast %cst_18 : f32 to vector<1x32xf32>
      %30 = arith.mulf %28, %29 : vector<1x32xf32>
      %31 = vector.shape_cast %30 : vector<1x32xf32> to vector<1x1x32xf32>
      %c0_19 = arith.constant 0 : index
      %c0_20 = arith.constant 0 : index
      %c0_21 = arith.constant 0 : index
      %32 = vector.load %arg7[%c0_19, %c0_20, %c0_21] : memref<1x1x32xf32, #tpu.memory_space<vmem>>, vector<1x1x32xf32>
      tpu.vector_store %arg7[%c0_19, %c0_20, %c0_21], %31 {strides = array<i32>} : memref<1x1x32xf32, #tpu.memory_space<vmem>>, vector<1x1x32xf32>,
      %c0_22 = arith.constant 0 : index
      %c0_23 = arith.constant 0 : index
      %33 = vector.load %arg5[%c0_22, %c0_23] : memref<32x3xf32, #tpu.memory_space<vmem>>, vector<32x3xf32>
      %cst_24 = arith.constant dense<0.000000e+00> : vector<1x3xf32>
      %34 = tpu.matmul %30, %33, %cst_24 {dimension_numbers = #tpu.dot_dimension_numbers<[1], [0], [0], [1], [0, 0, 1, 1], [], []>} : vector<1x32xf32>, vector<32x3xf32>, vector<1x3xf32> -> vector<1x3xf32>
      %c0_25 = arith.constant 0 : index
      %c0_26 = arith.constant 0 : index
      %35 = vector.load %arg6[%c0_25, %c0_26] : memref<1x3xf32, #tpu.memory_space<vmem>>, vector<1x3xf32>
      %36 = arith.addf %34, %35 : vector<1x3xf32>
      %37 = vector.shape_cast %36 : vector<1x3xf32> to vector<1x1x3xf32>
      %c0_27 = arith.constant 0 : index
      %c0_28 = arith.constant 0 : index
      %c0_29 = arith.constant 0 : index
      %38 = vector.load %arg8[%c0_27, %c0_28, %c0_29] : memref<1x1x3xf32, #tpu.memory_space<vmem>>, vector<1x1x3xf32>
      tpu.vector_store %arg8[%c0_27, %c0_28, %c0_29], %37 {strides = array<i32>} : memref<1x1x3xf32, #tpu.memory_space<vmem>>, vector<1x1x3xf32>,
    } else {
    }
    return
  }
  func.func @transform_0(%arg0: i32, %arg1: i32) -> (i32, i32, i32) {
    %c0_i32 = arith.constant 0 : i32
    %c0_i32_0 = arith.constant 0 : i32
    return %arg0, %c0_i32, %arg1 : i32, i32, i32
  }
  func.func @transform_1(%arg0: i32, %arg1: i32) -> (i32, i32) {
    %c0_i32 = arith.constant 0 : i32
    %c0_i32_0 = arith.constant 0 : i32
    %c0_i32_1 = arith.constant 0 : i32
    return %c0_i32, %c0_i32_0 : i32, i32
  }
  func.func @transform_2(%arg0: i32, %arg1: i32) -> (i32, i32) {
    %c0_i32 = arith.constant 0 : i32
    %c0_i32_0 = arith.constant 0 : i32
    %c0_i32_1 = arith.constant 0 : i32
    return %c0_i32, %c0_i32_0 : i32, i32
  }
  func.func @transform_3(%arg0: i32, %arg1: i32) -> (i32, i32) {
    %c0_i32 = arith.constant 0 : i32
    %c0_i32_0 = arith.constant 0 : i32
    %c0_i32_1 = arith.constant 0 : i32
    return %c0_i32, %c0_i32_0 : i32, i32
  }
  func.func @transform_4(%arg0: i32, %arg1: i32) -> (i32, i32) {
    %c0_i32 = arith.constant 0 : i32
    %c0_i32_0 = arith.constant 0 : i32
    %c0_i32_1 = arith.constant 0 : i32
    return %c0_i32, %c0_i32_0 : i32, i32
  }
  func.func @transform_5(%arg0: i32, %arg1: i32) -> (i32, i32, i32) {
    %c0_i32 = arith.constant 0 : i32
    %c0_i32_0 = arith.constant 0 : i32
    %c0_i32_1 = arith.constant 0 : i32
    return %arg0, %c0_i32, %c0_i32_0 : i32, i32, i32
  }
  func.func @transform_6(%arg0: i32, %arg1: i32) -> (i32, i32, i32) {
    %c0_i32 = arith.constant 0 : i32
    %c0_i32_0 = arith.constant 0 : i32
    %c0_i32_1 = arith.constant 0 : i32
    return %arg0, %c0_i32, %c0_i32_0 : i32, i32, i32
  }
}

</mosaic_0001>

<bundles_post_ra>
// kernel: tpu_custom_call.1
= control target key start
LH: loop header
LB: loop body
LE: loop exit
PB: predicated region body
PF: predicated region fallthrough
CT: control target
= control target key end

     0   :  { %12 = vsyncpa [#allocation4], 0  ;;  %s1166_s0 = inlined_call_operand.vmem [shape: f32[2,4,256], index: 0, kind: input, shape index: {}]   ;;  %s1167_s1 = inlined_call_operand.vmem [shape: f32[32,4], index: 1, kind: input, shape index: {}]   ;;  %s1168_s2 = inlined_call_operand.vmem [shape: f32[32,1], index: 2, kind: input, shape index: {}]   ;;  %s1169_s3 = inlined_call_operand.vmem [shape: f32[32,3], index: 3, kind: input, shape index: {}]   ;;  %s1170_s4 = inlined_call_operand.vmem [shape: f32[1,3], index: 4, kind: input, shape index: {}]   ;;  %s1171_s5 = inlined_call_operand.hbm [shape: f32[2,1,32], index: 5, kind: output, shape index: {0}]   ;;  %s1172_s6 = inlined_call_operand.hbm [shape: f32[2,1,3], index: 6, kind: output, shape index: {1}]  }
   0x1   :  { %14 = vsyncpa [#allocation4 + $0x1], 0 }
   0x2   :  { %15 = vsyncpa [#allocation6], 0 }
   0x3   :  { %17 = vsyncpa [#allocation6 + $0x1], 0  ;;  %s978_s21 = smov 0   ;;  %s980_s22 = smov 0  }
   0x4   :  { %s982_s23 = smov 0   ;;  %s984_s24 = smov 0  }
   0x5   :  { %s986_s25 = smov 0   ;;  %s988_s26 = smov 0  }
   0x6 LB: > { %s717_s27 = sadd.s32 4294967295, %s935_s26   ;;  %s718_s28 = sadd.s32 4294967294, %s935_s26   ;;  %s935_s26 = sphi %s988_s26, %s23_s26   ;;  %s931_s25 = sphi %s986_s25, %s1179_s25   ;;  %s927_s24 = sphi %s984_s24, %s1178_s24   ;;  %s923_s23 = sphi %s982_s23, %s1177_s23   ;;  %s919_s22 = sphi %s980_s22, %s1176_s22   ;;  %s915_s21 = sphi %s978_s21, %s1175_s21  }
   0x7   : > { %s35_s29 = sadd.s32 1, %s931_s25  ;;  %s154_s30 = sadd.s32 1, %s923_s23 }
   0x8   : > { %p37_p0 = scmp.ge.s32.totalorder %s35_s29, 2  ;;  %p164_p1 = scmp.ne.s32.totalorder %s923_s23, %s919_s22 }
   0x9   : > { %p165_p2 = scmp.eq.s32.totalorder %s717_s27, 1  ;;  %p170_p3 = scmp.ne.s32.totalorder %s919_s22, %s915_s21 }
   0xa   : > { %s1181_s29 = smov (%p37_p0, %s35_s29), 0  ;;  %p171_p5 = scmp.eq.s32.totalorder %s718_s28, 1 }
   0xb   : > { %p1018_p4 = por %p165_p2, %p164_p1  ;;  %s151_s8 = ssub.s32 %s931_s25, %s1181_s29 }
   0xc   : > { %p721_p6 = scmp.ge.s32.totalorder %s935_s26, 1  ;;  %p152_p7 = scmp.eq.s32.totalorder %s151_s8, 0 }
   0xd   : > { %p1025_p8 = por %p171_p5, %p170_p3  ;;  %p240_p9 = scmp.lt.s32.totalorder %s935_s26, 3 }
   0xe   : > { %s1031_s10 = scalar_select %p152_p7, %s923_s23, %s154_s30  }
   0xf   : > { %p241_p10 = pnand %p721_p6, %p240_p9 }
  0x10   : > { %p278_p11 = scmp.lt.s32.totalorder (!%p241_p10), %s927_s24, 1  ;;  %v937_v0 = vmov (!%p241_p10), 0.0   ;;  %v299_v1 = vld [vmem:[%s1168_s2] sm:$0xff] (!%p241_p10)  ;;  %v938_v2 = vmov (!%p241_p10), 0   ;;  %v301_v3 = vld [vmem:[%s1168_s2 + $0x10] sm:$0xff] (!%p241_p10)  ;;  %v300_v4 = vld [vmem:[%s1168_s2 + $0x8] sm:$0xff] (!%p241_p10)  ;;  %v480_v51 = vlaneseq (!%p241_p10) }
  0x11   : > { %244 = sbr.rel (%p241_p10) target bundleno = 639 (0x27f), region = 40  ;;  %408 = vmatprep.mubr.f32.mxu0 (!%p241_p10), %v937_v0  ;;  %822 = vset.pattern.permute.xlu0 (!%p241_p10), %v938_v2  ;;  %v302_v5 = vld [vmem:[%s1168_s2 + $0x18] sm:$0xff] (!%p241_p10)  ;;  %vm339_vm0 = vcmask (!%p241_p10), 1043456   ;;  %v295_v8 = vld [vmem:[%s1167_s1] sm:$0xff] (!%p241_p10)  ;;  %vm326_vm1 = vcmask (!%p241_p10), 31744   ;;  %v296_v9 = vld [vmem:[%s1167_s1 + $0x8] sm:$0xff] (!%p241_p10) }
  0x12   : > { %823 = vset.pattern.permute.xlu1 (!%p241_p10), %v938_v2  ;;  %306 = vperm.xlu0 (!%p241_p10), %822, %v299_v1   ;;  %v297_v10 = vld [vmem:[%s1167_s1 + $0x10] sm:$0xff] (!%p241_p10)  ;;  %v298_v11 = vld [vmem:[%s1167_s1 + $0x18] sm:$0xff] (!%p241_p10)  ;;  %v510_v44 = vld [vmem:[%s1169_s3] sm:$0xff] (!%p241_p10)  ;;  %v939_v47 = vmov (!%p241_p10), 0.0|0.0   ;;  %vm940_vm2 = vmmov (!%p241_p10), 0   ;;  %v481_v52 = vand.u32 (!%p241_p10), 127, %v480_v51 }
  0x13   : > { %316 = vperm.xlu1 (!%p241_p10), %823, %v301_v3   ;;  %v511_v45 = vld [vmem:[%s1169_s3 + $0x8] sm:$0xff] (!%p241_p10)  ;;  %752 = vmatprep.subr.bf16.mxu1 (!%p241_p10), %v939_v47  ;;  %v512_v48 = vld [vmem:[%s1169_s3 + $0x10] sm:$0xff] (!%p241_p10)  ;;  %v513_v49 = vld [vmem:[%s1169_s3 + $0x18] sm:$0xff] (!%p241_p10)  ;;  %v483_v57 = vshrl.u32 (!%p241_p10), %v480_v51, 7  ;;  %vm491_vm3 = vcmask (!%p241_p10), 130112   ;;  %s1080_s12 = sand.u32 (!%p241_p10), 1, %s919_s22  }
  0x14   : > { %v753_v46 = vpack.c.bf16 (!%p241_p10), %v511_v45, %v510_v44  ;;  %v756_v50 = vpack.c.bf16 (!%p241_p10), %v513_v49, %v512_v48  ;;  %749 = vmatprep.mubr.msk.f32.mxu1 (!%p241_p10), %vm940_vm2, %v937_v0  ;;  %v486_v53 = vadd.s32 (!%p241_p10), 4294967288, %v481_v52  ;;  %v493_v56 = vadd.s32 (!%p241_p10), 4294967280, %v481_v52  ;;  %s731_s14 = sshll.u32 (!%p241_p10), %s927_s24, 4  ;;  %s591_s19 = scalar_lea.sflag (!%p241_p10), [#allocation4], %s1080_s12 }
  0x15   : > { %v500_v60 = vadd.s32 (!%p241_p10), 4294967272, %v481_v52  ;;  %v484_v63 = vsub.s32 (!%p241_p10), %v481_v52, %v483_v57  ;;  %vm498_vm4 = vcmask (!%p241_p10), 195712   ;;  %vm505_vm5 = vcmask (!%p241_p10), 261312   ;;  %s1089_s17 = scalar_lea.hbm (!%p241_p10), %s1171_s5, %s731_s14  ;;  %s941_s27 = smov (!%p241_p10), [#allocation3]  }
  0x16   : > { %311 = vperm.xlu0 (!%p241_p10), %822, %v300_v4   ;;  %754 = vmatpush3.bf16.msra.mxu1 (!%p241_p10), %v753_v46  ;;  %v489_v58 = vsub.s32 (!%p241_p10), %v486_v53, %v483_v57  ;;  %v496_v61 = vsub.s32 (!%p241_p10), %v493_v56, %v483_v57  ;;  %vm515_vm6 = vcmask (!%p241_p10), 261120   ;;  %vm508_vm7 = vcmask (!%p241_p10), 253952   ;;  %s829_s28 = sshll.u32 (!%p241_p10), %s941_s27, 4  ;;  %s830_s28 = int_to_ptr.vmem [resolvable:$false] %s829_s28 }
  0x17   : > { %321 = vperm.xlu1 (!%p241_p10), %823, %v302_v5   ;;  %755 = vmatprep.subr.bf16.mxu1 (!%p241_p10), %v939_v47  ;;  %v503_v4 = vsub.s32 (!%p241_p10), %v500_v60, %v483_v57 }
  0x18   : > { %s279_s13 = scalar_select %p278_p11, %s927_s24, 1 }
  0x1a   : > { %s735_s16 = sshll.u32 %s279_s13, 3  ;;  %757 = vmatpush3.bf16.msra.mxu1 %v756_v50  ;;  %s270_s13 = scalar_lea.vmem [#allocation3], %s1080_s12 }
  0x1b   : > { %s285_s30 = scalar_lea.vmem %s1166_s0, %s735_s16  ;;  %s607_s18 = sshll.u32 %s270_s13, 4  ;;  %s608_s18 = int_to_ptr.vmem [resolvable:$true] %s607_s18 }
  0x1c   : > { %v303_v6 = vld [vmem:[%s285_s30] sm:$0xff]  ;;  %s825_s20 = scalar_lea.vmem %s608_s18, 16  ;;  %s831_s30 = scalar_lea.vmem %s830_s28, 32 }
  0x1d   : > { %v325_v7 = vcombine.high %v303_v6, %v303_v6  ;;  %p826_p12 = scmp.ne.s32.totalorder %s608_s18, %s825_s20  ;;  %p832_p1 = scmp.lt.s32.totalorder %s608_s18, %s830_s28 }
  0x1e   : > { %p833_p2 = scmp.lt.s32.totalorder %s831_s30, %s825_s20 }
  0x1f   : > { %724 = vmatprep.subr.msk.mxu0 %vm339_vm0, %v325_v7  ;;  %p827_p13 = pnand %p826_p12, %p1018_p4 }
  0x20   : > { %725 = vmatpush1.msk.msra.mxu0 %vm339_vm0, %v303_v6  ;;  %p834_p3 = por %p833_p2, %p832_p1 }
  0x21   : > { %726 = vmatmul.mubr.msk.f32.vlgmr.msra.gmra.mrb[0].mxu0 %vm326_vm1, %v295_v8  ;;  %p828_p0 = pneg %p827_p13 }
  0x22   : > { %414 = vmatprep.mubr.f32.mxu0 %v937_v0 }
  0x23   : > { %p835_p5 = pnand %p834_p3, %p828_p0 }
  0x25   : > { %727 = vmatmul.mubr.msk.f32.gmra.mrb[2].mxu0 %vm326_vm1, %v296_v9 }
  0x26   : > { %420 = vmatprep.mubr.f32.mxu0 %v937_v0 }
  0x29   : > { %728 = vmatmul.mubr.msk.f32.gmra.mrb[4].mxu0 %vm326_vm1, %v297_v10 }
  0x2a   : > { %426 = vmatprep.mubr.f32.mxu0 %v937_v0 }
  0x2d   : > { %729 = vmatmul.mubr.msk.f32.gmra.mrb[6].mxu0 %vm326_vm1, %v298_v11 }
  0x91   : > { %v307_v12 = vpop.permute.xlu0 %306 }
  0x92   : > { %v317_v23 = vpop.permute.xlu1 %316 }
  0x95   : > { %v312_v17 = vpop.permute.xlu0 %311 }
  0x96   : > { %v322_v34 = vpop.permute.xlu1 %321 }
  0xf4   : > { %v410_v13 = vpop.f32.mrb[0].mxu0 }
  0xf5   : > { %v411_v14 = vadd.f32 %v410_v13, %v307_v12  ;;  %v412_v15 = vpop.f32.mrb[1].mxu0 }
  0xf6   : > { %v413_v16 = vadd.f32 %v412_v15, %v307_v12 }
  0xf7   : > { %v433_v18 = vmax.f32 %v411_v14, 0.0 }
  0xf8   : > { %v434_v19 = vmax.f32 %v413_v16, 0.0  ;;  %v416_v20 = vpop.f32.mrb[2].mxu0 }
  0xf9   : > { %v417_v21 = vadd.f32 %v416_v20, %v312_v17  ;;  %v418_v22 = vpop.f32.mrb[3].mxu0 }
  0xfa   : > { %v419_v24 = vadd.f32 %v418_v22, %v312_v17  ;;  %v441_v25 = vadd.f32 %v434_v19, %v433_v18 }
  0xfb   : > { %v435_v26 = vmax.f32 %v417_v21, 0.0 }
  0xfc   : > { %v436_v27 = vmax.f32 %v419_v24, 0.0  ;;  %v422_v28 = vpop.f32.mrb[4].mxu0  ;;  %464 = vadd.xlane.f32.xlu0 %v441_v25 }
  0xfd   : > { %v423_v29 = vadd.f32 %v422_v28, %v317_v23  ;;  %v424_v30 = vpop.f32.mrb[5].mxu0 }
  0xfe   : > { %v425_v31 = vadd.f32 %v424_v30, %v317_v23  ;;  %v442_v32 = vadd.f32 %v436_v27, %v435_v26 }
  0xff   : > { %v437_v33 = vmax.f32 %v423_v29, 0.0 }
 0x100   : > { %v438_v35 = vmax.f32 %v425_v31, 0.0  ;;  %v428_v36 = vpop.f32.mrb[6].mxu0  ;;  %466 = vadd.xlane.f32.xlu1 %v442_v32 }
 0x101   : > { %v429_v37 = vadd.f32 %v428_v36, %v322_v34  ;;  %v430_v38 = vpop.f32.mrb[7].mxu0 }
 0x102   : > { %v431_v39 = vadd.f32 %v430_v38, %v322_v34  ;;  %v443_v40 = vadd.f32 %v438_v35, %v437_v33 }
 0x103   : > { %v439_v41 = vmax.f32 %v429_v37, 0.0 }
 0x104   : > { %v440_v42 = vmax.f32 %v431_v39, 0.0  ;;  %468 = vadd.xlane.f32.xlu0 %v443_v40 }
 0x106   : > { %v444_v43 = vadd.f32 %v440_v42, %v439_v41 }
 0x108   : > { %470 = vadd.xlane.f32.xlu0 %v444_v43 }
 0x189   : > { %v465_v54 = vpop.xlane.xlu0 %464 }
 0x18a   : > { %v472_v1 = vmul.f32 0.00390625, %v465_v54 }
 0x18c   : > { %v485_v6 = vrot.slane %v472_v1, %v484_v63 }
 0x18d   : > { %v467_v55 = vpop.xlane.xlu1 %466 }
 0x18e   : > { %v473_v59 = vmul.f32 0.00390625, %v467_v55 }
 0x190   : > { %v490_v3 = vrot.slane %v473_v59, %v489_v58 }
 0x191   : > { %v469_v62 = vpop.xlane.xlu0 %468 }
 0x192   : > { %v474_v2 = vmul.f32 0.00390625, %v469_v62  ;;  %v492_v8 = vsel %vm491_vm3, %v490_v3, %v485_v6 }
 0x194   : > { %v497_v0 = vrot.slane %v474_v2, %v496_v61 }
 0x195   : > { %v471_v5 = vpop.xlane.xlu0 %470 }
 0x196   : > { %v475_v7 = vmul.f32 0.00390625, %v471_v5  ;;  %v499_v10 = vsel %vm498_vm4, %v497_v0, %v492_v8 }
 0x198   : > { %v504_v9 = vrot.slane %v475_v7, %v503_v4 }
 0x19a   : > { %v506_v11 = vsel %vm505_vm5, %v504_v9, %v499_v10 }
 0x19b   : > { %750 = vmatmul.mubr.msk.f32.vlgmr.msra.gmra.mrb[0].mxu1 %vm515_vm6, %v506_v11  ;;  %509 = vst.msk [vmem:[%s270_s13] sm:$0x1] %vm508_vm7, %v506_v11 }
 0x19c   : > { %838 = shalt.err (!%p835_p5)
}
 0x19d   : > { %s839_s8 = scalar_lea.hbm %s1089_s17, 16  ;;  %s843_s15 = scalar_lea.hbm %s1171_s5, 32 }
 0x19e   : > { %p840_p6 = scmp.ne.s32.totalorder %s1089_s17, %s839_s8  ;;  %p844_p10 = scmp.lt.u32.totalorder %s1089_s17, %s1171_s5 }
 0x19f   : > { %p845_p11 = scmp.lt.u32.totalorder %s843_s15, %s839_s8  ;;  %p847_p13 = scmp.lt.u32.totalorder %s839_s8, %s1089_s17 }
 0x1a0   : > { %p841_p7 = pnand %p840_p6, %p1018_p4 }
 0x1a1   : > { %p846_p12 = por %p845_p11, %p844_p10 }
 0x1a2   : > { %p842_p9 = pneg %p841_p7 }
 0x1a3   : > { %p848_p0 = por %p847_p13, %p846_p12 }
 0x1a5   : > { %p849_p1 = pnand %p848_p0, %p842_p9 }
 0x1a7   : > { %852 = shalt.err (!%p849_p1)
}
 0x1a8   : > { %758 = dma.vmem_to_hbm [thread:$0]  (%p1018_p4), %s608_s18, 16, %s1089_s17, %s591_s19   ;;  %v514_v12 = vld [vmem:[%s1170_s4] sm:$0x1]  ;;  %vm588_vm8 = vcmask 16384  }
 0x1a9   : > { %s276_s30 = scalar_lea.vmem [#allocation5], %s1080_s12  ;;  %s1118_s15 = scalar_lea.hbm %s1172_s6, %s731_s14 }
 0x1aa   : > { %s620_s11 = sshll.u32 %s276_s30, 4  ;;  %s595_s17 = scalar_lea.sflag [#allocation6], %s1080_s12  ;;  %s1120_s11 = int_to_ptr.vmem [resolvable:$true] %s620_s11 }
 0x1ab   : > { %s853_s18 = scalar_lea.vmem %s1120_s11, 16  ;;  %s942_s19 = smov [#allocation5]  }
 0x1ac   : > { %p854_p2 = scmp.ne.s32.totalorder %s1120_s11, %s853_s18  ;;  %s857_s16 = sshll.u32 %s942_s19, 4  ;;  %s858_s16 = int_to_ptr.vmem [resolvable:$false] %s857_s16 }
 0x1ad   : > { %s859_s24 = scalar_lea.vmem %s858_s16, 32  ;;  %p860_p6 = scmp.lt.s32.totalorder %s1120_s11, %s858_s16 }
 0x1ae   : > { %p855_p3 = pnand %p854_p2, %p1018_p4  ;;  %p861_p7 = scmp.lt.s32.totalorder %s859_s24, %s853_s18 }
 0x1b0   : > { %p856_p5 = pneg %p855_p3  ;;  %p862_p9 = por %p861_p7, %p860_p6 }
 0x1b2   : > { %p863_p10 = pnand %p862_p9, %p856_p5 }
 0x26e   : > { %v584_v13 = vpop.f32.mrb[0].mxu1 }
 0x26f   : > { %v585_v14 = vadd.f32 %v584_v13, %v514_v12  ;;  %v751_v15 = vpop.f32.mrb[1].mxu1 }
 0x271   : > { %589 = vst.msk [vmem:[%s276_s30] sm:$0x1] %vm588_vm8, %v585_v14 }
 0x272   : > { %866 = shalt.err (!%p863_p10)
}
 0x273   : > { %s867_s12 = scalar_lea.hbm %s1118_s15, 16  ;;  %s871_s20 = scalar_lea.hbm %s1172_s6, 32 }
 0x274   : > { %p868_p11 = scmp.ne.s32.totalorder %s1118_s15, %s867_s12  ;;  %p872_p0 = scmp.lt.u32.totalorder %s1118_s15, %s1172_s6 }
 0x275   : > { %p873_p1 = scmp.lt.u32.totalorder %s871_s20, %s867_s12  ;;  %p875_p3 = scmp.lt.u32.totalorder %s867_s12, %s1118_s15 }
 0x276   : > { %p869_p12 = pnand %p868_p11, %p1018_p4 }
 0x277   : > { %p874_p2 = por %p873_p1, %p872_p0 }
 0x278   : > { %p870_p13 = pneg %p869_p12 }
 0x279   : > { %p876_p5 = por %p875_p3, %p874_p2 }
 0x27b   : > { %p877_p6 = pnand %p876_p5, %p870_p13 }
 0x27d   : > { %880 = shalt.err (!%p877_p6)
}
 0x27e   : > { %759 = dma.vmem_to_hbm [thread:$0]  (%p1018_p4), %s1120_s11, 16, %s1118_s15, %s595_s17  }
 0x27f PF: > { %p769_p7 = scmp.ge.s32.totalorder %s935_s26, 2  ;;  %s632_s8 = sand.u32 1, %s915_s21  }
 0x280   : > { %s633_s13 = scalar_lea.sflag [#allocation4], %s632_s8 }
 0x281   : > { %p763_p9 = pnand %p769_p7, %p1025_p8 }
 0x283   : > { %906 = dma.done.wait (!%p763_p9), %s633_s13, 16  }
 0x284   : > { %908 = vsyncadd (!%p763_p9), %s633_s13, 4294967280  ;;  %s641_s18 = scalar_lea.sflag [#allocation6], %s632_s8 }
 0x285   : > { %910 = dma.done.wait (!%p763_p9), %s641_s18, 16  }
 0x286   : > { %912 = vsyncadd (!%p763_p9), %s641_s18, 4294967280  ;;  %s23_s26 = sadd.s32 1, %s935_s26   ;;  %s1175_s21 = smov %s919_s22 }
 0x287   : > { %p20_p10 = scmp.ge.s32.totalorder %s23_s26, 4   ;;  %s1176_s22 = smov %s923_s23 }
 0x288   : > { %s1177_s23 = smov %s1031_s10  ;;  %s1178_s24 = smov %s931_s25 }
 0x289   : > { %s1179_s25 = smov %s1181_s29  ;;  %22 = sbr.rel (!%p20_p10) target bundleno = 6 (0x6), region = 100 }
 0x290   :  { %645 = vsyncpa [#allocation4], 1 }
 0x291   :  { %647 = vsyncpa [#allocation4 + $0x1], 1 }
 0x292   :  { %648 = vsyncpa [#allocation6], 1 }
 0x293   :  { %650 = vsyncpa [#allocation6 + $0x1], 1 }

</bundles_post_ra>
